<compile_context>
chip_gen: v6e
topology: v6e:2x2x1
jax: 0.10.0
libtpu: 0.0.40
codegen_flags: <defaults>
</compile_context>

<pallas_src>
import functools

import jax
import jax.numpy as jnp
from jax import lax
from jax.experimental import pallas as pl
from jax.experimental.pallas import tpu as pltpu


def _round_up(x, m):
    return (x + m - 1) // m * m


def _make_conv2d_kernel(N, Wp, Cout, Cpad, KH, KW, Ppad, Lout):
    """Shifted-matmul conv kernel over a channel-major, spatial-in-lanes slab."""

    def kernel(x_ref, w_ref, o_ref):
        # x_ref: (Cpad, Lin)         channels in sublanes, padded spatial in lanes
        # w_ref: (KH*KW, Cout, Cpad) per-tap weights (+ bias column on tap 0)
        # o_ref: (N, Cout, Ppad)     lane-dense output at padded spatial layout
        acc = jnp.zeros((Cout, Lout), jnp.float32)
        for kh in range(KH):
            for kw in range(KW):
                t = kh * KW + kw
                s = kh * Wp + kw                         # static lane shift
                patch = x_ref[:, s:s + Lout]             # (Cpad, Lout) window
                acc = acc + jnp.dot(w_ref[t], patch,
                                    preferred_element_type=jnp.float32)
        # 128-aligned lane slices -> unmasked dense stores, one per image.
        for n in range(N):
            o_ref[n] = acc[:, n * Ppad:(n + 1) * Ppad].astype(o_ref.dtype)

    return kernel


@functools.partial(jax.jit, static_argnames=("padding", "padding_mode"))
def convolution_forward(x_nchw, weight, bias, padding=None, padding_mode="constant"):
    """Forward of the `convolution` module (ndim=2, stride=1, dilation=1).

    x_nchw : (N, Cin, H, W)      -- PyTorch NCHW convention
    weight : (Cout, Cin, KH, KW) -- PyTorch Conv2d weight layout
    bias   : (Cout,)
    padding: None or int (symmetric spatial pad, applied as F.pad in the module).
    """
    N, Cin, H, W = x_nchw.shape
    Cout, Cin_w, KH, KW = weight.shape
    assert Cin == Cin_w
    # TODO(synk): only 'constant' padding_mode implemented ('reflect'/'replicate'
    # would change the wrapper border fill, not the kernel).
    assert padding_mode == "constant", "only constant padding_mode implemented"
    # TODO(synk): autopad / per-side padding lists of the module not implemented.

    pad = 0 if padding is None else int(padding)
    Hp, Wp = H + 2 * pad, W + 2 * pad          # padded spatial extent
    Ho, Wo = Hp - KH + 1, Wp - KW + 1          # output extent (stride 1)
    Pp = Hp * Wp                               # padded positions per image
    Ppad = _round_up(Pp, 128)                  # per-image lane-aligned slab
    Lout = N * Ppad                            # accumulator lane width
    T = KH * KW
    max_shift = (KH - 1) * Wp + (KW - 1)
    tail = _round_up(max_shift, 128) if max_shift > 0 else 0
    Lin = Lout + tail                          # input slab incl. shift tail
    Cpad = _round_up(Cin + 1, 8)               # channels + ones(bias) channel

    dtype = x_nchw.dtype

    # ---- wrapper-side layout plumbing (~10 KiB of data, fused by XLA) --------
    x_pad = jnp.pad(x_nchw, ((0, 0), (0, 0), (pad, pad), (pad, pad)))
    x_flat = jnp.transpose(x_pad, (1, 0, 2, 3)).reshape(Cin, N, Pp)
    x_flat = jnp.pad(x_flat, ((0, 0), (0, 0), (0, Ppad - Pp))).reshape(Cin, Lout)
    ones_row = jnp.ones((1, Lout), dtype)                        # bias channel
    x_aug = jnp.concatenate([x_flat, ones_row], axis=0)          # (Cin+1, Lout)
    x_aug = jnp.pad(x_aug, ((0, Cpad - (Cin + 1)), (0, tail)))   # (Cpad, Lin)

    w_taps = jnp.transpose(weight, (2, 3, 0, 1)).reshape(T, Cout, Cin)
    b_tap = jnp.zeros((T, Cout, 1), dtype).at[0].set(bias.reshape(Cout, 1))
    w_aug = jnp.concatenate([w_taps.astype(dtype), b_tap], axis=2)
    w_aug = jnp.pad(w_aug, ((0, 0), (0, 0), (0, Cpad - (Cin + 1))))  # (T,Cout,Cpad)

    kernel = _make_conv2d_kernel(N, Wp, Cout, Cpad, KH, KW, Ppad, Lout)

    itemsize = jnp.dtype(dtype).itemsize
    cost = pl.CostEstimate(
        flops=2 * N * Ho * Wo * KH * KW * Cin * Cout,
        transcendentals=0,
        bytes_accessed=(x_aug.size + w_aug.size + N * Cout * Ppad) * itemsize,
    )

    out = pl.pallas_call(
        kernel,
        out_shape=jax.ShapeDtypeStruct((N, Cout, Ppad), dtype),
        grid_spec=pltpu.PrefetchScalarGridSpec(
            num_scalar_prefetch=0,
            grid=(1,),   # whole (tiny) problem in one step, no scratch needed
            in_specs=[
                pl.BlockSpec((Cpad, Lin), lambda i: (0, 0)),
                pl.BlockSpec((T, Cout, Cpad), lambda i: (0, 0, 0)),
            ],
            out_specs=pl.BlockSpec((N, Cout, Ppad), lambda i: (0, 0, 0)),
        ),
        compiler_params=pltpu.CompilerParams(
            dimension_semantics=("arbitrary",),
        ),
        cost_estimate=cost,
    )(x_aug, w_aug)

    # Crop back to NCHW: (N, Cout, Ppad) -> (N, Cout, Hp, Wp)[..., :Ho, :Wo].
    out = out[:, :, :Pp].reshape(N, Cout, Hp, Wp)[:, :, :Ho, :Wo]
    return out


if __name__ == "__main__":
    # Module config: convolution(ndim=2, padding=1, padding_mode='constant',
    #                            in_channels=4, out_channels=8, kernel_size=3)
    N, Cin, H, W = 2, 4, 16, 16
    Cout, KH, KW = 8, 3, 3
    pad = 1

    key = jax.random.PRNGKey(0)
    kx, kwt, kb = jax.random.split(key, 3)

    x = jax.random.normal(kx, (N, Cin, H, W), dtype=jnp.float32)
    # Deterministic init (stand-in for Conv2d's kaiming-uniform default).
    fan_in = Cin * KH * KW
    bound = 1.0 / (fan_in ** 0.5)
    weight = jax.random.uniform(kwt, (Cout, Cin, KH, KW), jnp.float32, -bound, bound)
    bias = jax.random.uniform(kb, (Cout,), jnp.float32, -bound, bound)

    out = convolution_forward(x, weight, bias, padding=pad, padding_mode="constant")
    out = jax.block_until_ready(out)

    # Cross-check against XLA's conv (same semantics as torch Conv2d forward).
    ref = lax.conv_general_dilated(
        jnp.pad(x, ((0, 0), (0, 0), (pad, pad), (pad, pad))),
        weight,
        window_strides=(1, 1),
        padding="VALID",
        dimension_numbers=("NCHW", "OIHW", "NCHW"),
    ) + bias.reshape(1, Cout, 1, 1)
    assert out.shape == (N, Cout, H, W), out.shape
    assert jnp.allclose(out, ref, atol=1e-4, rtol=1e-4)

    print("KERNEL_OK")
</pallas_src>

<mosaic_0001>
module attributes {stable_mosaic.version = 11 : i64} {
  func.func @kernel(%arg0: i32, %arg1: memref<8x896xf32, #tpu.memory_space<vmem>>, %arg2: memref<9x8x8xf32, #tpu.memory_space<vmem>>, %arg3: memref<2x8x384xf32, #tpu.memory_space<vmem>>) attributes {dimension_semantics = [#tpu.dimension_semantics<arbitrary>], iteration_bounds = array<i64: 1>, scalar_prefetch = 0 : i64, scratch_operands = 0 : i64, tpu.core_type = #tpu.core_type<tc>, window_params = [{pipeline_mode = #tpu.pipeline_mode<synchronous>, transform_indices = @transform_0, window_bounds = array<i64: 8, 896>}, {pipeline_mode = #tpu.pipeline_mode<synchronous>, transform_indices = @transform_1, window_bounds = array<i64: 9, 8, 8>}, {pipeline_mode = #tpu.pipeline_mode<synchronous>, transform_indices = @transform_2, window_bounds = array<i64: 2, 8, 384>}]} {
    %cst = arith.constant 0.000000e+00 : f32
    %0 = vector.broadcast %cst : f32 to vector<8x768xf32>
    %c0 = arith.constant 0 : index
    %c0_0 = arith.constant 0 : index
    %1 = vector.load %arg1[%c0, %c0_0] : memref<8x896xf32, #tpu.memory_space<vmem>>, vector<8x768xf32>
    %c0_1 = arith.constant 0 : index
    %c0_2 = arith.constant 0 : index
    %c0_3 = arith.constant 0 : index
    %2 = vector.load %arg2[%c0_1, %c0_2, %c0_3] : memref<9x8x8xf32, #tpu.memory_space<vmem>>, vector<1x8x8xf32>
    %3 = vector.shape_cast %2 : vector<1x8x8xf32> to vector<8x8xf32>
    %cst_4 = arith.constant dense<0.000000e+00> : vector<8x768xf32>
    %4 = tpu.matmul %3, %1, %cst_4 {dimension_numbers = #tpu.dot_dimension_numbers<[1], [0], [0], [1], [0, 0, 1, 1], [], []>} : vector<8x8xf32>, vector<8x768xf32>, vector<8x768xf32> -> vector<8x768xf32>
    %5 = arith.addf %0, %4 : vector<8x768xf32>
    %c0_5 = arith.constant 0 : index
    %c1 = arith.constant 1 : index
    %6 = vector.load %arg1[%c0_5, %c1] : memref<8x896xf32, #tpu.memory_space<vmem>>, vector<8x768xf32>
    %c1_6 = arith.constant 1 : index
    %c0_7 = arith.constant 0 : index
    %c0_8 = arith.constant 0 : index
    %7 = vector.load %arg2[%c1_6, %c0_7, %c0_8] : memref<9x8x8xf32, #tpu.memory_space<vmem>>, vector<1x8x8xf32>
    %8 = vector.shape_cast %7 : vector<1x8x8xf32> to vector<8x8xf32>
    %cst_9 = arith.constant dense<0.000000e+00> : vector<8x768xf32>
    %9 = tpu.matmul %8, %6, %cst_9 {dimension_numbers = #tpu.dot_dimension_numbers<[1], [0], [0], [1], [0, 0, 1, 1], [], []>} : vector<8x8xf32>, vector<8x768xf32>, vector<8x768xf32> -> vector<8x768xf32>
    %10 = arith.addf %5, %9 : vector<8x768xf32>
    %c0_10 = arith.constant 0 : index
    %c2 = arith.constant 2 : index
    %11 = vector.load %arg1[%c0_10, %c2] : memref<8x896xf32, #tpu.memory_space<vmem>>, vector<8x768xf32>
    %c2_11 = arith.constant 2 : index
    %c0_12 = arith.constant 0 : index
    %c0_13 = arith.constant 0 : index
    %12 = vector.load %arg2[%c2_11, %c0_12, %c0_13] : memref<9x8x8xf32, #tpu.memory_space<vmem>>, vector<1x8x8xf32>
    %13 = vector.shape_cast %12 : vector<1x8x8xf32> to vector<8x8xf32>
    %cst_14 = arith.constant dense<0.000000e+00> : vector<8x768xf32>
    %14 = tpu.matmul %13, %11, %cst_14 {dimension_numbers = #tpu.dot_dimension_numbers<[1], [0], [0], [1], [0, 0, 1, 1], [], []>} : vector<8x8xf32>, vector<8x768xf32>, vector<8x768xf32> -> vector<8x768xf32>
    %15 = arith.addf %10, %14 : vector<8x768xf32>
    %c0_15 = arith.constant 0 : index
    %c18 = arith.constant 18 : index
    %16 = vector.load %arg1[%c0_15, %c18] : memref<8x896xf32, #tpu.memory_space<vmem>>, vector<8x768xf32>
    %c3 = arith.constant 3 : index
    %c0_16 = arith.constant 0 : index
    %c0_17 = arith.constant 0 : index
    %17 = vector.load %arg2[%c3, %c0_16, %c0_17] : memref<9x8x8xf32, #tpu.memory_space<vmem>>, vector<1x8x8xf32>
    %18 = vector.shape_cast %17 : vector<1x8x8xf32> to vector<8x8xf32>
    %cst_18 = arith.constant dense<0.000000e+00> : vector<8x768xf32>
    %19 = tpu.matmul %18, %16, %cst_18 {dimension_numbers = #tpu.dot_dimension_numbers<[1], [0], [0], [1], [0, 0, 1, 1], [], []>} : vector<8x8xf32>, vector<8x768xf32>, vector<8x768xf32> -> vector<8x768xf32>
    %20 = arith.addf %15, %19 : vector<8x768xf32>
    %c0_19 = arith.constant 0 : index
    %c19 = arith.constant 19 : index
    %21 = vector.load %arg1[%c0_19, %c19] : memref<8x896xf32, #tpu.memory_space<vmem>>, vector<8x768xf32>
    %c4 = arith.constant 4 : index
    %c0_20 = arith.constant 0 : index
    %c0_21 = arith.constant 0 : index
    %22 = vector.load %arg2[%c4, %c0_20, %c0_21] : memref<9x8x8xf32, #tpu.memory_space<vmem>>, vector<1x8x8xf32>
    %23 = vector.shape_cast %22 : vector<1x8x8xf32> to vector<8x8xf32>
    %cst_22 = arith.constant dense<0.000000e+00> : vector<8x768xf32>
    %24 = tpu.matmul %23, %21, %cst_22 {dimension_numbers = #tpu.dot_dimension_numbers<[1], [0], [0], [1], [0, 0, 1, 1], [], []>} : vector<8x8xf32>, vector<8x768xf32>, vector<8x768xf32> -> vector<8x768xf32>
    %25 = arith.addf %20, %24 : vector<8x768xf32>
    %c0_23 = arith.constant 0 : index
    %c20 = arith.constant 20 : index
    %26 = vector.load %arg1[%c0_23, %c20] : memref<8x896xf32, #tpu.memory_space<vmem>>, vector<8x768xf32>
    %c5 = arith.constant 5 : index
    %c0_24 = arith.constant 0 : index
    %c0_25 = arith.constant 0 : index
    %27 = vector.load %arg2[%c5, %c0_24, %c0_25] : memref<9x8x8xf32, #tpu.memory_space<vmem>>, vector<1x8x8xf32>
    %28 = vector.shape_cast %27 : vector<1x8x8xf32> to vector<8x8xf32>
    %cst_26 = arith.constant dense<0.000000e+00> : vector<8x768xf32>
    %29 = tpu.matmul %28, %26, %cst_26 {dimension_numbers = #tpu.dot_dimension_numbers<[1], [0], [0], [1], [0, 0, 1, 1], [], []>} : vector<8x8xf32>, vector<8x768xf32>, vector<8x768xf32> -> vector<8x768xf32>
    %30 = arith.addf %25, %29 : vector<8x768xf32>
    %c0_27 = arith.constant 0 : index
    %c36 = arith.constant 36 : index
    %31 = vector.load %arg1[%c0_27, %c36] : memref<8x896xf32, #tpu.memory_space<vmem>>, vector<8x768xf32>
    %c6 = arith.constant 6 : index
    %c0_28 = arith.constant 0 : index
    %c0_29 = arith.constant 0 : index
    %32 = vector.load %arg2[%c6, %c0_28, %c0_29] : memref<9x8x8xf32, #tpu.memory_space<vmem>>, vector<1x8x8xf32>
    %33 = vector.shape_cast %32 : vector<1x8x8xf32> to vector<8x8xf32>
    %cst_30 = arith.constant dense<0.000000e+00> : vector<8x768xf32>
    %34 = tpu.matmul %33, %31, %cst_30 {dimension_numbers = #tpu.dot_dimension_numbers<[1], [0], [0], [1], [0, 0, 1, 1], [], []>} : vector<8x8xf32>, vector<8x768xf32>, vector<8x768xf32> -> vector<8x768xf32>
    %35 = arith.addf %30, %34 : vector<8x768xf32>
    %c0_31 = arith.constant 0 : index
    %c37 = arith.constant 37 : index
    %36 = vector.load %arg1[%c0_31, %c37] : memref<8x896xf32, #tpu.memory_space<vmem>>, vector<8x768xf32>
    %c7 = arith.constant 7 : index
    %c0_32 = arith.constant 0 : index
    %c0_33 = arith.constant 0 : index
    %37 = vector.load %arg2[%c7, %c0_32, %c0_33] : memref<9x8x8xf32, #tpu.memory_space<vmem>>, vector<1x8x8xf32>
    %38 = vector.shape_cast %37 : vector<1x8x8xf32> to vector<8x8xf32>
    %cst_34 = arith.constant dense<0.000000e+00> : vector<8x768xf32>
    %39 = tpu.matmul %38, %36, %cst_34 {dimension_numbers = #tpu.dot_dimension_numbers<[1], [0], [0], [1], [0, 0, 1, 1], [], []>} : vector<8x8xf32>, vector<8x768xf32>, vector<8x768xf32> -> vector<8x768xf32>
    %40 = arith.addf %35, %39 : vector<8x768xf32>
    %c0_35 = arith.constant 0 : index
    %c38 = arith.constant 38 : index
    %41 = vector.load %arg1[%c0_35, %c38] : memref<8x896xf32, #tpu.memory_space<vmem>>, vector<8x768xf32>
    %c8 = arith.constant 8 : index
    %c0_36 = arith.constant 0 : index
    %c0_37 = arith.constant 0 : index
    %42 = vector.load %arg2[%c8, %c0_36, %c0_37] : memref<9x8x8xf32, #tpu.memory_space<vmem>>, vector<1x8x8xf32>
    %43 = vector.shape_cast %42 : vector<1x8x8xf32> to vector<8x8xf32>
    %cst_38 = arith.constant dense<0.000000e+00> : vector<8x768xf32>
    %44 = tpu.matmul %43, %41, %cst_38 {dimension_numbers = #tpu.dot_dimension_numbers<[1], [0], [0], [1], [0, 0, 1, 1], [], []>} : vector<8x8xf32>, vector<8x768xf32>, vector<8x768xf32> -> vector<8x768xf32>
    %45 = arith.addf %40, %44 : vector<8x768xf32>
    %46 = vector.extract_strided_slice %45 {offsets = [0, 0], sizes = [8, 384], strides = [1, 1]} : vector<8x768xf32> to vector<8x384xf32>
    %c0_39 = arith.constant 0 : index
    %c0_40 = arith.constant 0 : index
    %c0_41 = arith.constant 0 : index
    %47 = vector.load %arg3[%c0_39, %c0_40, %c0_41] : memref<2x8x384xf32, #tpu.memory_space<vmem>>, vector<1x8x384xf32>
    %48 = vector.shape_cast %47 : vector<1x8x384xf32> to vector<8x384xf32>
    %49 = vector.shape_cast %46 : vector<8x384xf32> to vector<1x8x384xf32>
    tpu.vector_store %arg3[%c0_39, %c0_40, %c0_41], %49 {strides = array<i32>} : memref<2x8x384xf32, #tpu.memory_space<vmem>>, vector<1x8x384xf32>,
    %50 = vector.extract_strided_slice %45 {offsets = [0, 384], sizes = [8, 384], strides = [1, 1]} : vector<8x768xf32> to vector<8x384xf32>
    %c1_42 = arith.constant 1 : index
    %c0_43 = arith.constant 0 : index
    %c0_44 = arith.constant 0 : index
    %51 = vector.load %arg3[%c1_42, %c0_43, %c0_44] : memref<2x8x384xf32, #tpu.memory_space<vmem>>, vector<1x8x384xf32>
    %52 = vector.shape_cast %51 : vector<1x8x384xf32> to vector<8x384xf32>
    %53 = vector.shape_cast %50 : vector<8x384xf32> to vector<1x8x384xf32>
    tpu.vector_store %arg3[%c1_42, %c0_43, %c0_44], %53 {strides = array<i32>} : memref<2x8x384xf32, #tpu.memory_space<vmem>>, vector<1x8x384xf32>,
    return
  }
  func.func @transform_0(%arg0: i32) -> (i32, i32) {
    %c0_i32 = arith.constant 0 : i32
    %c0_i32_0 = arith.constant 0 : i32
    %c0_i32_1 = arith.constant 0 : i32
    return %c0_i32, %c0_i32_0 : i32, i32
  }
  func.func @transform_1(%arg0: i32) -> (i32, i32, i32) {
    %c0_i32 = arith.constant 0 : i32
    %c0_i32_0 = arith.constant 0 : i32
    %c0_i32_1 = arith.constant 0 : i32
    %c0_i32_2 = arith.constant 0 : i32
    return %c0_i32, %c0_i32_0, %c0_i32_1 : i32, i32, i32
  }
  func.func @transform_2(%arg0: i32) -> (i32, i32, i32) {
    %c0_i32 = arith.constant 0 : i32
    %c0_i32_0 = arith.constant 0 : i32
    %c0_i32_1 = arith.constant 0 : i32
    %c0_i32_2 = arith.constant 0 : i32
    return %c0_i32, %c0_i32_0, %c0_i32_1 : i32, i32, i32
  }
}

</mosaic_0001>

<bundles_post_ra>
// kernel: convolution_forward.1
= control target key start
LH: loop header
LB: loop body
LE: loop exit
PB: predicated region body
PF: predicated region fallthrough
CT: control target
= control target key end

     0   :  { %v2309_v2 = vmov 0.0   ;;  %s2310_s13 = smov 127   ;;  %s2311_s24 = smov 126   ;;  %vm48_vm0 = vcmask 1039360   ;;  %vm61_vm1 = vcmask 64512   ;;  %vm510_vm2 = vcmask 1031168   ;;  %s2567_s0 = inlined_call_operand.vmem [shape: f32[8,896], index: 0, kind: input, shape index: {}]   ;;  %s2568_s1 = inlined_call_operand.vmem [shape: f32[9,8,8], index: 1, kind: input, shape index: {}]   ;;  %s2569_s2 = inlined_call_operand.vmem [shape: f32[2,8,384], index: 2, kind: output, shape index: {}]  }
   0x1   :  { %v2336_v0 = vld [vmem:[%s2567_s0 + $0x8] sm:$0xff]  ;;  %v2341_v1 = vld [vmem:[%s2567_s0] sm:$0xff]  ;;  %129 = vmatprep.mubr.f32.mxu0 %v2309_v2  ;;  %200 = vmatprep.mubr.f32.mxu1 %v2309_v2  ;;  %v2350_v3 = vld [vmem:[%s2567_s0 + $0x10] sm:$0xff]  ;;  %s2312_s25 = smov 110   ;;  %s2314_s26 = smov 108   ;;  %vm761_vm3 = vcmask 900096  }
   0x2   :  { %36 = vrot.lane.b32.xlu0 %v2336_v0, %s2310_s13  ;;  %34 = vrot.lane.b32.xlu1 %v2341_v1, %s2310_s13  ;;  %v2355_v4 = vld [vmem:[%s2567_s0 + $0x18] sm:$0xff]  ;;  %v2362_v5 = vld [vmem:[%s2567_s0 + $0x20] sm:$0xff]  ;;  %s2315_s27 = smov 92   ;;  %s2316_s28 = smov 91   ;;  %vm1012_vm4 = vcmask 891904   ;;  %vm1263_vm5 = vcmask 883712  }
   0x3   :  { %v2367_v6 = vld [vmem:[%s2567_s0 + $0x28] sm:$0xff]  ;;  %v24_v7 = vld [vmem:[%s2567_s0 + $0x30] sm:$0xff]  ;;  %s2313_s0 = smov 109   ;;  %s2317_s29 = smov 90   ;;  %v17_v23 = vld [vmem:[%s2568_s1] sm:$0xff]  ;;  %vm1514_vm6 = vcmask 752640  }
   0x4   :  { %v2262_v13 = vld [vmem:[%s2568_s1 + $0x8] sm:$0xff]  ;;  %v2269_v32 = vld [vmem:[%s2568_s1 + $0x10] sm:$0xff]  ;;  %v2273_v44 = vld [vmem:[%s2568_s1 + $0x18] sm:$0xff]  ;;  %vm1765_vm7 = vcmask 744448   ;;  %vm2016_vm8 = vcmask 736256  }
   0x5   :  { %v2277_v56 = vld [vmem:[%s2568_s1 + $0x20] sm:$0xff] }
   0x6   :  { %38 = vrot.lane.b32.xlu0 %v2350_v3, %s2310_s13  ;;  %40 = vrot.lane.b32.xlu1 %v2355_v4, %s2310_s13 }
   0xa   :  { %42 = vrot.lane.b32.xlu0 %v2362_v5, %s2310_s13  ;;  %44 = vrot.lane.b32.xlu1 %v2367_v6, %s2310_s13 }
   0xe   :  { %46 = vrot.lane.b32.xlu0 %v24_v7, %s2310_s13  ;;  %498 = vrot.lane.b32.xlu1 %v2336_v0, %s2311_s24 }
  0x12   :  { %500 = vrot.lane.b32.xlu0 %v2350_v3, %s2311_s24  ;;  %496 = vrot.lane.b32.xlu1 %v2341_v1, %s2311_s24 }
  0x16   :  { %502 = vrot.lane.b32.xlu0 %v2355_v4, %s2311_s24  ;;  %504 = vrot.lane.b32.xlu1 %v2362_v5, %s2311_s24 }
  0x1a   :  { %506 = vrot.lane.b32.xlu0 %v2367_v6, %s2311_s24  ;;  %508 = vrot.lane.b32.xlu1 %v24_v7, %s2311_s24 }
  0x1e   :  { %749 = vrot.lane.b32.xlu0 %v2336_v0, %s2312_s25  ;;  %751 = vrot.lane.b32.xlu1 %v2350_v3, %s2312_s25 }
  0x22   :  { %753 = vrot.lane.b32.xlu0 %v2355_v4, %s2312_s25  ;;  %755 = vrot.lane.b32.xlu1 %v2362_v5, %s2312_s25 }
  0x26   :  { %747 = vrot.lane.b32.xlu0 %v2341_v1, %s2312_s25  ;;  %757 = vrot.lane.b32.xlu1 %v2367_v6, %s2312_s25 }
  0x2a   :  { %759 = vrot.lane.b32.xlu0 %v24_v7, %s2312_s25  ;;  %1000 = vrot.lane.b32.xlu1 %v2336_v0, %s2313_s0 }
  0x2e   :  { %1002 = vrot.lane.b32.xlu0 %v2350_v3, %s2313_s0  ;;  %998 = vrot.lane.b32.xlu1 %v2341_v1, %s2313_s0 }
  0x32   :  { %1004 = vrot.lane.b32.xlu0 %v2355_v4, %s2313_s0  ;;  %1006 = vrot.lane.b32.xlu1 %v2362_v5, %s2313_s0 }
  0x36   :  { %1008 = vrot.lane.b32.xlu0 %v2367_v6, %s2313_s0  ;;  %1010 = vrot.lane.b32.xlu1 %v24_v7, %s2313_s0 }
  0x3a   :  { %1251 = vrot.lane.b32.xlu0 %v2336_v0, %s2314_s26  ;;  %1253 = vrot.lane.b32.xlu1 %v2350_v3, %s2314_s26 }
  0x3e   :  { %1255 = vrot.lane.b32.xlu0 %v2355_v4, %s2314_s26  ;;  %1257 = vrot.lane.b32.xlu1 %v2362_v5, %s2314_s26 }
  0x42   :  { %1249 = vrot.lane.b32.xlu0 %v2341_v1, %s2314_s26  ;;  %1259 = vrot.lane.b32.xlu1 %v2367_v6, %s2314_s26 }
  0x46   :  { %1261 = vrot.lane.b32.xlu0 %v24_v7, %s2314_s26  ;;  %1502 = vrot.lane.b32.xlu1 %v2336_v0, %s2315_s27 }
  0x4a   :  { %1504 = vrot.lane.b32.xlu0 %v2350_v3, %s2315_s27  ;;  %1500 = vrot.lane.b32.xlu1 %v2341_v1, %s2315_s27 }
  0x4e   :  { %1506 = vrot.lane.b32.xlu0 %v2355_v4, %s2315_s27  ;;  %1508 = vrot.lane.b32.xlu1 %v2362_v5, %s2315_s27 }
  0x52   :  { %1510 = vrot.lane.b32.xlu0 %v2367_v6, %s2315_s27  ;;  %1512 = vrot.lane.b32.xlu1 %v24_v7, %s2315_s27 }
  0x56   :  { %1753 = vrot.lane.b32.xlu0 %v2336_v0, %s2316_s28  ;;  %1755 = vrot.lane.b32.xlu1 %v2350_v3, %s2316_s28 }
  0x5a   :  { %1757 = vrot.lane.b32.xlu0 %v2355_v4, %s2316_s28  ;;  %1759 = vrot.lane.b32.xlu1 %v2362_v5, %s2316_s28 }
  0x5e   :  { %1751 = vrot.lane.b32.xlu0 %v2341_v1, %s2316_s28  ;;  %1761 = vrot.lane.b32.xlu1 %v2367_v6, %s2316_s28 }
  0x62   :  { %1763 = vrot.lane.b32.xlu0 %v24_v7, %s2316_s28  ;;  %2004 = vrot.lane.b32.xlu1 %v2336_v0, %s2317_s29 }
  0x66   :  { %2006 = vrot.lane.b32.xlu0 %v2350_v3, %s2317_s29  ;;  %2002 = vrot.lane.b32.xlu1 %v2341_v1, %s2317_s29 }
  0x6a   :  { %2008 = vrot.lane.b32.xlu0 %v2355_v4, %s2317_s29  ;;  %2010 = vrot.lane.b32.xlu1 %v2362_v5, %s2317_s29 }
  0x6e   :  { %2012 = vrot.lane.b32.xlu0 %v2367_v6, %s2317_s29  ;;  %2014 = vrot.lane.b32.xlu1 %v24_v7, %s2317_s29 }
  0x74   :  { %v37_v8 = vpop.permute.xlu0 %36  ;;  %v35_v9 = vpop.permute.xlu1 %34 }
  0x75   :  { %v49_v14 = vsel %vm48_vm0, %v35_v9, %v37_v8  ;;  %v2281_v9 = vld [vmem:[%s2568_s1 + $0x28] sm:$0xff] }
  0x78   :  { %v39_v10 = vpop.permute.xlu0 %38  ;;  %v41_v11 = vpop.permute.xlu1 %40 }
  0x79   :  { %v50_v12 = vsel %vm48_vm0, %v37_v8, %v39_v10  ;;  %v51_v18 = vsel %vm48_vm0, %v39_v10, %v41_v11 }
  0x7a   :  { %95 = vmatprep.subr.mxu0 %v50_v12 }
  0x7b   :  { %96 = vmatpush1.msra.mxu0 %v49_v14 }
  0x7c   :  { %v43_v15 = vpop.permute.xlu0 %42  ;;  %v45_v16 = vpop.permute.xlu1 %44  ;;  %2263 = vmatmul.mubr.msk.f32.vlgmr.msra.gmra.mxu0 %vm61_vm1, %v2262_v13 }
  0x7d   :  { %v52_v17 = vsel %vm48_vm0, %v41_v11, %v43_v15  ;;  %271 = vmatprep.mubr.f32.mxu0 %v2309_v2  ;;  %v53_v22 = vsel %vm48_vm0, %v43_v15, %v45_v16 }
  0x7e   :  { %166 = vmatprep.subr.mxu1 %v52_v17 }
  0x7f   :  { %167 = vmatpush1.msra.mxu1 %v51_v18 }
  0x80   :  { %v47_v19 = vpop.permute.xlu0 %46  ;;  %v499_v20 = vpop.permute.xlu1 %498  ;;  %2264 = vmatmul.mubr.msk.f32.vlgmr.msra.gmra.mxu1 %vm61_vm1, %v2262_v13  ;;  %311 = vmatprep.subr.mxu1 %v2336_v0 }
  0x81   :  { %v54_v21 = vsel %vm48_vm0, %v45_v16, %v47_v19  ;;  %312 = vmatpush1.msra.mxu1 %v2341_v1  ;;  %345 = vmatprep.mubr.f32.mxu1 %v2309_v2 }
  0x82   :  { %237 = vmatprep.subr.mxu0 %v54_v21  ;;  %453 = vmatprep.subr.mxu1 %v2367_v6  ;;  %v2285_v21 = vld [vmem:[%s2568_s1 + $0x30] sm:$0xff] }
  0x83   :  { %238 = vmatpush1.msra.mxu0 %v53_v22 }
  0x84   :  { %v501_v24 = vpop.permute.xlu0 %500  ;;  %2265 = vmatmul.mubr.msk.f32.vlgmr.msra.gmra.mxu0 %vm61_vm1, %v2262_v13  ;;  %v497_v25 = vpop.permute.xlu1 %496  ;;  %382 = vmatprep.subr.mxu0 %v2355_v4 }
  0x85   :  { %383 = vmatpush1.msra.mxu0 %v2350_v3  ;;  %v512_v26 = vsel %vm510_vm2, %v499_v20, %v501_v24  ;;  %2266 = vmatmul.mubr.msk.f32.vlgmr.msra.gmra.mxu1 %vm61_vm1, %v17_v23  ;;  %v511_v27 = vsel %vm510_vm2, %v497_v25, %v499_v20 }
  0x86   :  { %556 = vmatprep.subr.mxu0 %v512_v26  ;;  %416 = vmatprep.mubr.f32.mxu0 %v2309_v2 }
  0x87   :  { %454 = vmatpush1.msra.mxu1 %v2362_v5  ;;  %487 = vmatprep.mubr.f32.mxu1 %v2309_v2 }
  0x88   :  { %v503_v28 = vpop.permute.xlu0 %502  ;;  %v505_v29 = vpop.permute.xlu1 %504  ;;  %2267 = vmatmul.mubr.msk.f32.vlgmr.msra.gmra.mxu0 %vm61_vm1, %v17_v23 }
  0x89   :  { %v513_v30 = vsel %vm510_vm2, %v501_v24, %v503_v28  ;;  %557 = vmatpush1.msra.mxu0 %v511_v27  ;;  %v514_v31 = vsel %vm510_vm2, %v503_v28, %v505_v29  ;;  %2268 = vmatmul.mubr.msk.f32.vlgmr.msra.gmra.mxu1 %vm61_vm1, %v17_v23 }
  0x8a   :  { %627 = vmatprep.subr.mxu1 %v514_v31  ;;  %590 = vmatprep.mubr.f32.mxu0 %v2309_v2 }
  0x8b   :  { %628 = vmatpush1.msra.mxu1 %v513_v30  ;;  %661 = vmatprep.mubr.f32.mxu1 %v2309_v2 }
  0x8c   :  { %v507_v33 = vpop.permute.xlu0 %506  ;;  %v509_v34 = vpop.permute.xlu1 %508  ;;  %2270 = vmatmul.mubr.msk.f32.vlgmr.msra.gmra.mxu0 %vm61_vm1, %v2269_v32 }
  0x8d   :  { %v515_v35 = vsel %vm510_vm2, %v505_v29, %v507_v33  ;;  %v516_v36 = vsel %vm510_vm2, %v507_v33, %v509_v34  ;;  %732 = vmatprep.mubr.f32.mxu0 %v2309_v2  ;;  %2271 = vmatmul.mubr.msk.f32.vlgmr.msra.gmra.mxu1 %vm61_vm1, %v2269_v32 }
  0x8e   :  { %698 = vmatprep.subr.mxu0 %v516_v36  ;;  %841 = vmatprep.mubr.f32.mxu1 %v2309_v2 }
  0x8f   :  { %699 = vmatpush1.msra.mxu0 %v515_v35 }
  0x90   :  { %v750_v37 = vpop.permute.xlu0 %749  ;;  %v752_v38 = vpop.permute.xlu1 %751  ;;  %2272 = vmatmul.mubr.msk.f32.vlgmr.msra.gmra.mxu0 %vm61_vm1, %v2269_v32 }
  0x91   :  { %v763_v39 = vsel %vm761_vm3, %v750_v37, %v752_v38  ;;  %912 = vmatprep.mubr.f32.mxu0 %v2309_v2 }
  0x92   :  { %807 = vmatprep.subr.mxu1 %v763_v39 }
  0x94   :  { %v754_v40 = vpop.permute.xlu0 %753  ;;  %v756_v41 = vpop.permute.xlu1 %755 }
  0x95   :  { %v764_v42 = vsel %vm761_vm3, %v752_v38, %v754_v40  ;;  %v765_v43 = vsel %vm761_vm3, %v754_v40, %v756_v41 }
  0x96   :  { %878 = vmatprep.subr.mxu0 %v765_v43 }
  0x97   :  { %879 = vmatpush1.msra.mxu0 %v764_v42 }
  0x98   :  { %v748_v45 = vpop.permute.xlu0 %747  ;;  %v758_v46 = vpop.permute.xlu1 %757  ;;  %2275 = vmatmul.mubr.msk.f32.vlgmr.msra.gmra.mxu0 %vm61_vm1, %v2273_v44 }
  0x99   :  { %v762_v47 = vsel %vm761_vm3, %v748_v45, %v750_v37  ;;  %1092 = vmatprep.mubr.f32.mxu0 %v2309_v2  ;;  %v766_v51 = vsel %vm761_vm3, %v756_v41, %v758_v46  ;;  %v2289_v37 = vld [vmem:[%s2568_s1 + $0x38] sm:$0xff] }
  0x9a   :  { %808 = vmatpush1.msra.mxu1 %v762_v47 }
  0x9b   :  { %2274 = vmatmul.mubr.msk.f32.vlgmr.msra.gmra.mxu1 %vm61_vm1, %v2273_v44 }
  0x9c   :  { %v760_v48 = vpop.permute.xlu0 %759  ;;  %v1001_v49 = vpop.permute.xlu1 %1000  ;;  %983 = vmatprep.mubr.f32.mxu1 %v2309_v2 }
  0x9d   :  { %v767_v50 = vsel %vm761_vm3, %v758_v46, %v760_v48 }
  0x9e   :  { %949 = vmatprep.subr.mxu1 %v767_v50 }
  0x9f   :  { %950 = vmatpush1.msra.mxu1 %v766_v51 }
  0xa0   :  { %v1003_v52 = vpop.permute.xlu0 %1002  ;;  %v999_v53 = vpop.permute.xlu1 %998  ;;  %2276 = vmatmul.mubr.msk.f32.vlgmr.msra.gmra.mxu1 %vm61_vm1, %v2273_v44 }
  0xa1   :  { %v1013_v54 = vsel %vm1012_vm4, %v999_v53, %v1001_v49  ;;  %v1014_v55 = vsel %vm1012_vm4, %v1001_v49, %v1003_v52  ;;  %1163 = vmatprep.mubr.f32.mxu1 %v2309_v2  ;;  %v2293_v49 = vld [vmem:[%s2568_s1 + $0x40] sm:$0xff] }
  0xa2   :  { %1058 = vmatprep.subr.mxu0 %v1014_v55 }
  0xa3   :  { %1059 = vmatpush1.msra.mxu0 %v1013_v54 }
  0xa4   :  { %v1005_v57 = vpop.permute.xlu0 %1004  ;;  %v1007_v58 = vpop.permute.xlu1 %1006  ;;  %2278 = vmatmul.mubr.msk.f32.vlgmr.msra.gmra.mxu0 %vm61_vm1, %v2277_v56 }
  0xa5   :  { %v1015_v59 = vsel %vm1012_vm4, %v1003_v52, %v1005_v57  ;;  %v1016_v60 = vsel %vm1012_vm4, %v1005_v57, %v1007_v58  ;;  %1234 = vmatprep.mubr.f32.mxu0 %v2309_v2 }
  0xa6   :  { %1129 = vmatprep.subr.mxu1 %v1016_v60 }
  0xa7   :  { %1130 = vmatpush1.msra.mxu1 %v1015_v59 }
  0xa8   :  { %v1009_v61 = vpop.permute.xlu0 %1008  ;;  %v1011_v62 = vpop.permute.xlu1 %1010  ;;  %2279 = vmatmul.mubr.msk.f32.vlgmr.msra.gmra.mxu1 %vm61_vm1, %v2277_v56 }
  0xa9   :  { %v1017_v63 = vsel %vm1012_vm4, %v1007_v58, %v1009_v61  ;;  %v1018_v0 = vsel %vm1012_vm4, %v1009_v61, %v1011_v62  ;;  %1343 = vmatprep.mubr.f32.mxu1 %v2309_v2 }
  0xaa   :  { %1200 = vmatprep.subr.mxu0 %v1018_v0 }
  0xab   :  { %1201 = vmatpush1.msra.mxu0 %v1017_v63 }
  0xac   :  { %v1252_v1 = vpop.permute.xlu0 %1251  ;;  %v1254_v3 = vpop.permute.xlu1 %1253  ;;  %2280 = vmatmul.mubr.msk.f32.vlgmr.msra.gmra.mxu0 %vm61_vm1, %v2277_v56 }
  0xad   :  { %v1265_v4 = vsel %vm1263_vm5, %v1252_v1, %v1254_v3  ;;  %1414 = vmatprep.mubr.f32.mxu0 %v2309_v2 }
  0xae   :  { %1309 = vmatprep.subr.mxu1 %v1265_v4 }
  0xb0   :  { %v1256_v5 = vpop.permute.xlu0 %1255  ;;  %v1258_v6 = vpop.permute.xlu1 %1257 }
  0xb1   :  { %v1266_v7 = vsel %vm1263_vm5, %v1254_v3, %v1256_v5  ;;  %v1267_v8 = vsel %vm1263_vm5, %v1256_v5, %v1258_v6 }
  0xb2   :  { %1380 = vmatprep.subr.mxu0 %v1267_v8 }
  0xb3   :  { %1381 = vmatpush1.msra.mxu0 %v1266_v7 }
  0xb4   :  { %v1250_v10 = vpop.permute.xlu0 %1249  ;;  %v1260_v11 = vpop.permute.xlu1 %1259  ;;  %2283 = vmatmul.mubr.msk.f32.vlgmr.msra.gmra.mxu0 %vm61_vm1, %v2281_v9 }
  0xb5   :  { %v1264_v12 = vsel %vm1263_vm5, %v1250_v10, %v1252_v1  ;;  %1594 = vmatprep.mubr.f32.mxu0 %v2309_v2  ;;  %v1268_v16 = vsel %vm1263_vm5, %v1258_v6, %v1260_v11 }
  0xb6   :  { %1310 = vmatpush1.msra.mxu1 %v1264_v12 }
  0xb7   :  { %2282 = vmatmul.mubr.msk.f32.vlgmr.msra.gmra.mxu1 %vm61_vm1, %v2281_v9 }
  0xb8   :  { %v1262_v13 = vpop.permute.xlu0 %1261  ;;  %v1503_v14 = vpop.permute.xlu1 %1502  ;;  %1485 = vmatprep.mubr.f32.mxu1 %v2309_v2 }
  0xb9   :  { %v1269_v15 = vsel %vm1263_vm5, %v1260_v11, %v1262_v13 }
  0xba   :  { %1451 = vmatprep.subr.mxu1 %v1269_v15 }
  0xbb   :  { %1452 = vmatpush1.msra.mxu1 %v1268_v16 }
  0xbc   :  { %v1505_v17 = vpop.permute.xlu0 %1504  ;;  %v1501_v18 = vpop.permute.xlu1 %1500  ;;  %2284 = vmatmul.mubr.msk.f32.vlgmr.msra.gmra.mxu1 %vm61_vm1, %v2281_v9 }
  0xbd   :  { %v1515_v19 = vsel %vm1514_vm6, %v1501_v18, %v1503_v14  ;;  %v1516_v20 = vsel %vm1514_vm6, %v1503_v14, %v1505_v17  ;;  %1665 = vmatprep.mubr.f32.mxu1 %v2309_v2 }
  0xbe   :  { %1560 = vmatprep.subr.mxu0 %v1516_v20 }
  0xbf   :  { %1561 = vmatpush1.msra.mxu0 %v1515_v19 }
  0xc0   :  { %v1507_v22 = vpop.permute.xlu0 %1506  ;;  %v1509_v23 = vpop.permute.xlu1 %1508  ;;  %2286 = vmatmul.mubr.msk.f32.vlgmr.msra.gmra.mxu0 %vm61_vm1, %v2285_v21 }
  0xc1   :  { %v1517_v24 = vsel %vm1514_vm6, %v1505_v17, %v1507_v22  ;;  %v1518_v25 = vsel %vm1514_vm6, %v1507_v22, %v1509_v23  ;;  %1736 = vmatprep.mubr.f32.mxu0 %v2309_v2 }
  0xc2   :  { %1631 = vmatprep.subr.mxu1 %v1518_v25 }
  0xc3   :  { %1632 = vmatpush1.msra.mxu1 %v1517_v24 }
  0xc4   :  { %v1511_v26 = vpop.permute.xlu0 %1510  ;;  %v1513_v27 = vpop.permute.xlu1 %1512  ;;  %2287 = vmatmul.mubr.msk.f32.vlgmr.msra.gmra.mxu1 %vm61_vm1, %v2285_v21 }
  0xc5   :  { %v1519_v28 = vsel %vm1514_vm6, %v1509_v23, %v1511_v26  ;;  %v1520_v29 = vsel %vm1514_vm6, %v1511_v26, %v1513_v27  ;;  %1845 = vmatprep.mubr.f32.mxu1 %v2309_v2 }
  0xc6   :  { %1702 = vmatprep.subr.mxu0 %v1520_v29 }
  0xc7   :  { %1703 = vmatpush1.msra.mxu0 %v1519_v28 }
  0xc8   :  { %v1754_v30 = vpop.permute.xlu0 %1753  ;;  %v1756_v31 = vpop.permute.xlu1 %1755  ;;  %2288 = vmatmul.mubr.msk.f32.vlgmr.msra.gmra.mxu0 %vm61_vm1, %v2285_v21 }
  0xc9   :  { %v1767_v32 = vsel %vm1765_vm7, %v1754_v30, %v1756_v31  ;;  %1916 = vmatprep.mubr.f32.mxu0 %v2309_v2 }
  0xca   :  { %1811 = vmatprep.subr.mxu1 %v1767_v32 }
  0xcc   :  { %v1758_v33 = vpop.permute.xlu0 %1757  ;;  %v1760_v34 = vpop.permute.xlu1 %1759 }
  0xcd   :  { %v1768_v35 = vsel %vm1765_vm7, %v1756_v31, %v1758_v33  ;;  %v1769_v36 = vsel %vm1765_vm7, %v1758_v33, %v1760_v34 }
  0xce   :  { %1882 = vmatprep.subr.mxu0 %v1769_v36 }
  0xcf   :  { %1883 = vmatpush1.msra.mxu0 %v1768_v35 }
  0xd0   :  { %v1752_v38 = vpop.permute.xlu0 %1751  ;;  %v1762_v39 = vpop.permute.xlu1 %1761  ;;  %2291 = vmatmul.mubr.msk.f32.vlgmr.msra.gmra.mxu0 %vm61_vm1, %v2289_v37 }
  0xd1   :  { %v1766_v40 = vsel %vm1765_vm7, %v1752_v38, %v1754_v30  ;;  %2096 = vmatprep.mubr.f32.mxu0 %v2309_v2  ;;  %v1770_v44 = vsel %vm1765_vm7, %v1760_v34, %v1762_v39 }
  0xd2   :  { %1812 = vmatpush1.msra.mxu1 %v1766_v40 }
  0xd3   :  { %2290 = vmatmul.mubr.msk.f32.vlgmr.msra.gmra.mxu1 %vm61_vm1, %v2289_v37 }
  0xd4   :  { %v1764_v41 = vpop.permute.xlu0 %1763  ;;  %v2005_v42 = vpop.permute.xlu1 %2004  ;;  %1987 = vmatprep.mubr.f32.mxu1 %v2309_v2 }
  0xd5   :  { %v1771_v43 = vsel %vm1765_vm7, %v1762_v39, %v1764_v41 }
  0xd6   :  { %1953 = vmatprep.subr.mxu1 %v1771_v43 }
  0xd7   :  { %1954 = vmatpush1.msra.mxu1 %v1770_v44 }
  0xd8   :  { %v2007_v45 = vpop.permute.xlu0 %2006  ;;  %v2003_v46 = vpop.permute.xlu1 %2002  ;;  %2292 = vmatmul.mubr.msk.f32.vlgmr.msra.gmra.mxu1 %vm61_vm1, %v2289_v37 }
  0xd9   :  { %v2017_v47 = vsel %vm2016_vm8, %v2003_v46, %v2005_v42  ;;  %v2018_v48 = vsel %vm2016_vm8, %v2005_v42, %v2007_v45  ;;  %2167 = vmatprep.mubr.f32.mxu1 %v2309_v2 }
  0xda   :  { %2062 = vmatprep.subr.mxu0 %v2018_v48 }
  0xdb   :  { %2063 = vmatpush1.msra.mxu0 %v2017_v47 }
  0xdc   :  { %v2009_v50 = vpop.permute.xlu0 %2008  ;;  %v2011_v51 = vpop.permute.xlu1 %2010  ;;  %2294 = vmatmul.mubr.msk.f32.vlgmr.msra.gmra.mxu0 %vm61_vm1, %v2293_v49 }
  0xdd   :  { %v2019_v52 = vsel %vm2016_vm8, %v2007_v45, %v2009_v50  ;;  %v2020_v53 = vsel %vm2016_vm8, %v2009_v50, %v2011_v51  ;;  %2238 = vmatprep.mubr.f32.mxu0 %v2309_v2 }
  0xde   :  { %2133 = vmatprep.subr.mxu1 %v2020_v53 }
  0xdf   :  { %2134 = vmatpush1.msra.mxu1 %v2019_v52 }
  0xe0   :  { %v2013_v54 = vpop.permute.xlu0 %2012  ;;  %v2015_v55 = vpop.permute.xlu1 %2014  ;;  %2295 = vmatmul.mubr.msk.f32.vlgmr.msra.gmra.mxu1 %vm61_vm1, %v2293_v49 }
  0xe1   :  { %v2021_v56 = vsel %vm2016_vm8, %v2011_v51, %v2013_v54  ;;  %v2022_v57 = vsel %vm2016_vm8, %v2013_v54, %v2015_v55 }
  0xe2   :  { %2204 = vmatprep.subr.mxu0 %v2022_v57 }
  0xe3   :  { %2205 = vmatpush1.msra.mxu0 %v2021_v56 }
  0xe4   :  { %2296 = vmatmul.mubr.msk.f32.vlgmr.msra.gmra.mxu0 %vm61_vm1, %v2293_v49 }
 0x13c   :  { %v131_v58 = vpop.f32.mrf.mxu0 }
 0x13e   :  { %v133_v60 = vpop.f32.mrf.mxu0 }
 0x140   :  { %v202_v59 = vpop.f32.mrf.mxu1 }
 0x142   :  { %v204_v61 = vpop.f32.mrf.mxu1 }
 0x144   :  { %v273_v62 = vpop.f32.mrf.mxu0 }
 0x145   :  { %v347_v2 = vpop.f32.mrf.mxu1 }
 0x146   :  { %v275_v63 = vpop.f32.mrf.mxu0  ;;  %v348_v27 = vadd.f32 %v347_v2, %v131_v58 }
 0x147   :  { %v349_v0 = vpop.f32.mrf.mxu1 }
 0x148   :  { %v418_v1 = vpop.f32.mrf.mxu0  ;;  %v350_v30 = vadd.f32 %v349_v0, %v133_v60 }
 0x149   :  { %v489_v3 = vpop.f32.mrf.mxu1  ;;  %v419_v32 = vadd.f32 %v418_v1, %v202_v59 }
 0x14a   :  { %v420_v4 = vpop.f32.mrf.mxu0  ;;  %v490_v39 = vadd.f32 %v489_v3, %v273_v62 }
 0x14b   :  { %v491_v5 = vpop.f32.mrf.mxu1  ;;  %v421_v35 = vadd.f32 %v420_v4, %v204_v61 }
 0x14c   :  { %v592_v6 = vpop.f32.mrf.mxu0  ;;  %v492_v46 = vadd.f32 %v491_v5, %v275_v63 }
 0x14d   :  { %v663_v7 = vpop.f32.mrf.mxu1  ;;  %v739_v33 = vadd.f32 %v592_v6, %v348_v27 }
 0x14e   :  { %v594_v8 = vpop.f32.mrf.mxu0  ;;  %v741_v40 = vadd.f32 %v663_v7, %v419_v32 }
 0x14f   :  { %v665_v9 = vpop.f32.mrf.mxu1  ;;  %v740_v36 = vadd.f32 %v594_v8, %v350_v30 }
 0x150   :  { %v734_v10 = vpop.f32.mrf.mxu0  ;;  %v742_v43 = vadd.f32 %v665_v9, %v421_v35 }
 0x151   :  { %v743_v47 = vadd.f32 %v734_v10, %v490_v39 }
 0x152   :  { %v736_v12 = vpop.f32.mrf.mxu0 }
 0x153   :  { %v744_v54 = vadd.f32 %v736_v12, %v492_v46 }
 0x158   :  { %v914_v14 = vpop.f32.mrf.mxu0 }
 0x159   :  { %v992_v48 = vadd.f32 %v914_v14, %v741_v40 }
 0x15a   :  { %v916_v16 = vpop.f32.mrf.mxu0 }
 0x15b   :  { %v843_v11 = vpop.f32.mrf.mxu1  ;;  %v993_v52 = vadd.f32 %v916_v16, %v742_v43 }
 0x15c   :  { %v990_v41 = vadd.f32 %v843_v11, %v739_v33 }
 0x15d   :  { %v845_v13 = vpop.f32.mrf.mxu1 }
 0x15e   :  { %v991_v44 = vadd.f32 %v845_v13, %v740_v36 }
 0x160   :  { %v985_v15 = vpop.f32.mrf.mxu1 }
 0x161   :  { %v994_v57 = vadd.f32 %v985_v15, %v743_v47 }
 0x162   :  { %v987_v17 = vpop.f32.mrf.mxu1 }
 0x163   :  { %v995_v2 = vadd.f32 %v987_v17, %v744_v54 }
 0x164   :  { %v1094_v18 = vpop.f32.mrf.mxu0 }
 0x165   :  { %v1241_v49 = vadd.f32 %v1094_v18, %v990_v41 }
 0x166   :  { %v1096_v20 = vpop.f32.mrf.mxu0 }
 0x167   :  { %v1242_v53 = vadd.f32 %v1096_v20, %v991_v44 }
 0x168   :  { %v1165_v19 = vpop.f32.mrf.mxu1 }
 0x169   :  { %v1243_v58 = vadd.f32 %v1165_v19, %v992_v48 }
 0x16a   :  { %v1167_v21 = vpop.f32.mrf.mxu1 }
 0x16b   :  { %v1244_v60 = vadd.f32 %v1167_v21, %v993_v52 }
 0x16c   :  { %v1236_v22 = vpop.f32.mrf.mxu0 }
 0x16d   :  { %v1245_v63 = vadd.f32 %v1236_v22, %v994_v57 }
 0x16e   :  { %v1238_v24 = vpop.f32.mrf.mxu0 }
 0x16f   :  { %v1246_v11 = vadd.f32 %v1238_v24, %v995_v2 }
 0x174   :  { %v1416_v26 = vpop.f32.mrf.mxu0 }
 0x175   :  { %v1494_v3 = vadd.f32 %v1416_v26, %v1243_v58 }
 0x176   :  { %v1418_v29 = vpop.f32.mrf.mxu0 }
 0x177   :  { %v1345_v23 = vpop.f32.mrf.mxu1  ;;  %v1495_v7 = vadd.f32 %v1418_v29, %v1244_v60 }
 0x178   :  { %v1492_v59 = vadd.f32 %v1345_v23, %v1241_v49 }
 0x179   :  { %v1347_v25 = vpop.f32.mrf.mxu1 }
 0x17a   :  { %v1493_v61 = vadd.f32 %v1347_v25, %v1242_v53 }
 0x17c   :  { %v1487_v28 = vpop.f32.mrf.mxu1 }
 0x17d   :  { %v1496_v14 = vadd.f32 %v1487_v28, %v1245_v63 }
 0x17e   :  { %v1489_v34 = vpop.f32.mrf.mxu1 }
 0x17f   :  { %v1497_v19 = vadd.f32 %v1489_v34, %v1246_v11 }
 0x180   :  { %v1596_v31 = vpop.f32.mrf.mxu0 }
 0x181   :  { %v1743_v62 = vadd.f32 %v1596_v31, %v1492_v59 }
 0x182   :  { %v1598_v38 = vpop.f32.mrf.mxu0 }
 0x183   :  { %v1744_v4 = vadd.f32 %v1598_v38, %v1493_v61 }
 0x184   :  { %v1667_v37 = vpop.f32.mrf.mxu1 }
 0x185   :  { %v1745_v8 = vadd.f32 %v1667_v37, %v1494_v3 }
 0x186   :  { %v1669_v45 = vpop.f32.mrf.mxu1 }
 0x187   :  { %v1746_v15 = vadd.f32 %v1669_v45, %v1495_v7 }
 0x188   :  { %v1738_v42 = vpop.f32.mrf.mxu0 }
 0x189   :  { %v1747_v20 = vadd.f32 %v1738_v42, %v1496_v14 }
 0x18a   :  { %v1740_v51 = vpop.f32.mrf.mxu0 }
 0x18b   :  { %v1748_v24 = vadd.f32 %v1740_v51, %v1497_v19 }
 0x190   :  { %v1918_v55 = vpop.f32.mrf.mxu0 }
 0x191   :  { %v1996_v16 = vadd.f32 %v1918_v55, %v1745_v8 }
 0x192   :  { %v1920_v0 = vpop.f32.mrf.mxu0 }
 0x193   :  { %v1847_v50 = vpop.f32.mrf.mxu1  ;;  %v1997_v21 = vadd.f32 %v1920_v0, %v1746_v15 }
 0x194   :  { %v1994_v5 = vadd.f32 %v1847_v50, %v1743_v62 }
 0x195   :  { %v1849_v56 = vpop.f32.mrf.mxu1 }
 0x196   :  { %v1995_v9 = vadd.f32 %v1849_v56, %v1744_v4 }
 0x198   :  { %v1989_v1 = vpop.f32.mrf.mxu1 }
 0x199   :  { %v1998_v25 = vadd.f32 %v1989_v1, %v1747_v20 }
 0x19a   :  { %v1991_v12 = vpop.f32.mrf.mxu1 }
 0x19b   :  { %v1999_v28 = vadd.f32 %v1991_v12, %v1748_v24 }
 0x19c   :  { %v2098_v6 = vpop.f32.mrf.mxu0 }
 0x19d   :  { %v2245_v10 = vadd.f32 %v2098_v6, %v1994_v5 }
 0x19e   :  { %v2100_v13 = vpop.f32.mrf.mxu0 }
 0x19f   :  { %2251 = vst [vmem:[%s2569_s2] sm:$0xff] %v2245_v10  ;;  %v2246_v17 = vadd.f32 %v2100_v13, %v1995_v9 }
 0x1a0   :  { %v2169_v18 = vpop.f32.mrf.mxu1 }
 0x1a1   :  { %2252 = vst [vmem:[%s2569_s2 + $0x8] sm:$0xff] %v2246_v17  ;;  %v2247_v22 = vadd.f32 %v2169_v18, %v1996_v16 }
 0x1a2   :  { %v2171_v23 = vpop.f32.mrf.mxu1 }
 0x1a3   :  { %2253 = vst [vmem:[%s2569_s2 + $0x10] sm:$0xff] %v2247_v22  ;;  %v2248_v26 = vadd.f32 %v2171_v23, %v1997_v21 }
 0x1a4   :  { %v2240_v27 = vpop.f32.mrf.mxu0 }
 0x1a5   :  { %2297 = vst [vmem:[%s2569_s2 + $0x18] sm:$0xff] %v2248_v26  ;;  %v2249_v29 = vadd.f32 %v2240_v27, %v1998_v25 }
 0x1a6   :  { %v2242_v30 = vpop.f32.mrf.mxu0 }
 0x1a7   :  { %2298 = vst [vmem:[%s2569_s2 + $0x20] sm:$0xff] %v2249_v29  ;;  %v2250_v31 = vadd.f32 %v2242_v30, %v1999_v28 }
 0x1a9   :  { %2299 = vst [vmem:[%s2569_s2 + $0x28] sm:$0xff] %v2250_v31 }

</bundles_post_ra>
